<compile_context>
chip_gen: v6e
topology: v6e:2x2x1
jax: 0.10.0
libtpu: 0.0.40
codegen_flags: <defaults>
</compile_context>

<pallas_src>
import jax
import jax.numpy as jnp
from jax.experimental import pallas as pl
from jax.experimental.pallas import tpu as pltpu

LANE = 128  # TPU lane width


def mlp_kernel(xt_ref, w1_ref, b1_ref, w2_ref, b2_ref, w3_ref, b3_ref, o_ref):
    # Batch-on-lane orientation: every vreg is fully lane-populated.
    xt = xt_ref[...].astype(jnp.bfloat16)                         # (10, TB)
    # Layer 1: (32,10)bf16 @ (10,TB)bf16 -> f32 acc, +bias, ReLU (f32)
    h1 = jnp.dot(w1_ref[...], xt, preferred_element_type=jnp.float32)
    h1 = jnp.maximum(h1 + b1_ref[...], 0.0)                       # (32, TB)
    # Layer 2: (16,32)bf16 @ (32,TB)bf16 -> f32 acc, +bias, ReLU (f32)
    h2 = jnp.dot(w2_ref[...], h1.astype(jnp.bfloat16),
                 preferred_element_type=jnp.float32)
    h2 = jnp.maximum(h2 + b2_ref[...], 0.0)                       # (16, TB)
    # Layer 3: (1,16)@(16,TB) -> lane-dense (1, TB) output block
    o = jnp.dot(w3_ref[...], h2.astype(jnp.bfloat16),
                preferred_element_type=jnp.float32) + b3_ref[...]
    o_ref[...] = o.astype(o_ref.dtype)


def _vmem_budget_bytes():
    # Generation-aware VMEM budget with ~25% headroom:
    # v7x -> ~48 MiB of 64 MiB/TC, v5e/v6e -> ~96 MiB of 128 MiB.
    try:
        cap = pltpu.get_tpu_info().vmem_capacity_bytes
    except Exception:
        cap = 64 * 1024 * 1024  # conservative fallback (v7x per-core figure)
    return int(cap) * 3 // 4


def _pick_tile(B, tb, vmem_budget):
    if tb is None:
        # TB-proportional VMEM per batch column (double-buffered x/out blocks
        # plus f32/bf16 intermediates), with margin: ~768 B/column.
        tb = min(vmem_budget // 768, 32768)
    # Keep the grid length >= 2 when possible (two TensorCores on v7x).
    half = (B + 1) // 2
    tb = min(tb, ((half + LANE - 1) // LANE) * LANE)
    # Lane-dim blocks must be a multiple of 128.
    tb = max(LANE, (tb // LANE) * LANE)
    return tb


def mlp_forward(x, w1, b1, w2, b2, w3, b3, *, tb=None):
    """x: (B, 10) f32; w_i: PyTorch layout (out, in); b_i: (out,)."""
    B, F = x.shape
    vmem_budget = _vmem_budget_bytes()
    tb = _pick_tile(B, tb, vmem_budget)
    b_pad = ((B + tb - 1) // tb) * tb

    # Batch on lanes: (F, b_pad). The transpose (+ tail pad) is the only
    # wrapper-side pass over x; the bf16 cast happens inside the kernel.
    xt = x.T
    if b_pad != B:
        xt = jnp.pad(xt, ((0, 0), (0, b_pad - B)))

    # Tiny parameter tensors: bf16 weights, f32 column-vector biases.
    w1b = w1.astype(jnp.bfloat16)                                  # (32, 10)
    w2b = w2.astype(jnp.bfloat16)                                  # (16, 32)
    w3b = w3.astype(jnp.bfloat16)                                  # (1, 16)
    b1c = b1.reshape(-1, 1).astype(jnp.float32)                    # (32, 1)
    b2c = b2.reshape(-1, 1).astype(jnp.float32)                    # (16, 1)
    b3c = b3.reshape(-1, 1).astype(jnp.float32)                    # (1, 1)

    const = lambda i: (0, 0)  # params: same (VMEM-resident) block every step
    out = pl.pallas_call(
        mlp_kernel,
        out_shape=jax.ShapeDtypeStruct((1, b_pad), jnp.float32),
        grid=(b_pad // tb,),
        in_specs=[
            pl.BlockSpec((F, tb), lambda i: (0, i)),   # x^T: batch tiled on lanes
            pl.BlockSpec(w1b.shape, const),
            pl.BlockSpec(b1c.shape, const),
            pl.BlockSpec(w2b.shape, const),
            pl.BlockSpec(b2c.shape, const),
            pl.BlockSpec(w3b.shape, const),
            pl.BlockSpec(b3c.shape, const),
        ],
        out_specs=pl.BlockSpec((1, tb), lambda i: (0, i)),         # lane-dense
        compiler_params=pltpu.CompilerParams(
            dimension_semantics=("parallel",),
            vmem_limit_bytes=vmem_budget,
        ),
    )(xt, w1b, b1c, w2b, b2c, w3b, b3c)
    return out[0, :B].reshape(B, 1)


def init_params(key):
    # nn.Linear-style init, PyTorch layout: W (out, in), b (out,).
    def linear(key, fan_in, fan_out):
        k_w, k_b = jax.random.split(key)
        bound = 1.0 / jnp.sqrt(fan_in)
        w = jax.random.uniform(k_w, (fan_out, fan_in), jnp.float32, -bound, bound)
        b = jax.random.uniform(k_b, (fan_out,), jnp.float32, -bound, bound)
        return w, b

    k1, k2, k3 = jax.random.split(key, 3)
    w1, b1 = linear(k1, 10, 32)
    w2, b2 = linear(k2, 32, 16)
    w3, b3 = linear(k3, 16, 1)
    return w1, b1, w2, b2, w3, b3


def reference(x, w1, b1, w2, b2, w3, b3):
    # Mirrors the kernel's bf16-in / f32-accumulate numerics exactly
    # (y = x @ W^T + b, PyTorch Linear semantics).
    bf = lambda a: a.astype(jnp.bfloat16).astype(jnp.float32)
    hp = jax.lax.Precision.HIGHEST
    h1 = jnp.maximum(jnp.dot(bf(x), bf(w1).T, precision=hp) + b1, 0.0)
    h2 = jnp.maximum(jnp.dot(bf(h1), bf(w2).T, precision=hp) + b2, 0.0)
    return jnp.dot(bf(h2), bf(w3).T, precision=hp) + b3


if __name__ == "__main__":
    key = jax.random.PRNGKey(0)
    k_x, k_x2, k_p = jax.random.split(key, 3)
    params = init_params(k_p)

    # Small case (single tile, ragged B < one lane tile).
    B = 8
    x = jax.random.normal(k_x, (B, 10), jnp.float32)
    out = mlp_forward(x, *params)
    jax.block_until_ready(out)
    ref = reference(x, *params)
    assert out.shape == (B, 1)
    assert jnp.allclose(out, ref, atol=1e-4, rtol=1e-4)

    # Multi-tile case with a ragged tail (exercises grid + lane-padding path).
    B2 = 300
    x2 = jax.random.normal(k_x2, (B2, 10), jnp.float32)
    out2 = mlp_forward(x2, *params, tb=128)
    jax.block_until_ready(out2)
    ref2 = reference(x2, *params)
    assert out2.shape == (B2, 1)
    assert jnp.allclose(out2, ref2, atol=1e-4, rtol=1e-4)

    print("KERNEL_OK")
</pallas_src>

<mosaic_0001>
module attributes {stable_mosaic.version = 11 : i64} {
  func.func @mlp_kernel(%arg0: i32, %arg1: memref<10x128xf32, #tpu.memory_space<vmem>>, %arg2: memref<32x10xbf16, #tpu.memory_space<vmem>>, %arg3: memref<32x1xf32, #tpu.memory_space<vmem>>, %arg4: memref<16x32xbf16, #tpu.memory_space<vmem>>, %arg5: memref<16x1xf32, #tpu.memory_space<vmem>>, %arg6: memref<1x16xbf16, #tpu.memory_space<vmem>>, %arg7: memref<1x1xf32, #tpu.memory_space<vmem>>, %arg8: memref<1x128xf32, #tpu.memory_space<vmem>>) attributes {dimension_semantics = [#tpu.dimension_semantics<parallel>], iteration_bounds = array<i64: 1>, scalar_prefetch = 0 : i64, scratch_operands = 0 : i64, tpu.core_type = #tpu.core_type<tc>, window_params = [{transform_indices = @transform_0, window_bounds = array<i64: 10, 128>}, {pipeline_mode = #tpu.pipeline_mode<synchronous>, transform_indices = @transform_1, window_bounds = array<i64: 32, 10>}, {pipeline_mode = #tpu.pipeline_mode<synchronous>, transform_indices = @transform_2, window_bounds = array<i64: 32, 1>}, {pipeline_mode = #tpu.pipeline_mode<synchronous>, transform_indices = @transform_3, window_bounds = array<i64: 16, 32>}, {pipeline_mode = #tpu.pipeline_mode<synchronous>, transform_indices = @transform_4, window_bounds = array<i64: 16, 1>}, {pipeline_mode = #tpu.pipeline_mode<synchronous>, transform_indices = @transform_5, window_bounds = array<i64: 1, 16>}, {pipeline_mode = #tpu.pipeline_mode<synchronous>, transform_indices = @transform_6, window_bounds = array<i64: 1, 1>}, {transform_indices = @transform_7, window_bounds = array<i64: 1, 128>}]} {
    %c0 = arith.constant 0 : index
    %c0_0 = arith.constant 0 : index
    %0 = vector.load %arg1[%c0, %c0_0] : memref<10x128xf32, #tpu.memory_space<vmem>>, vector<10x128xf32>
    %1 = arith.truncf %0 : vector<10x128xf32> to vector<10x128xbf16>
    %c0_1 = arith.constant 0 : index
    %c0_2 = arith.constant 0 : index
    %2 = vector.load %arg2[%c0_1, %c0_2] : memref<32x10xbf16, #tpu.memory_space<vmem>>, vector<32x10xbf16>
    %cst = arith.constant dense<0.000000e+00> : vector<32x128xf32>
    %3 = tpu.matmul %2, %1, %cst {dimension_numbers = #tpu.dot_dimension_numbers<[1], [0], [0], [1], [0, 0, 1, 1], [], []>} : vector<32x10xbf16>, vector<10x128xbf16>, vector<32x128xf32> -> vector<32x128xf32>
    %c0_3 = arith.constant 0 : index
    %c0_4 = arith.constant 0 : index
    %4 = vector.load %arg3[%c0_3, %c0_4] : memref<32x1xf32, #tpu.memory_space<vmem>>, vector<32x1xf32>
    %5 = vector.broadcast %4 : vector<32x1xf32> to vector<32x128xf32>
    %6 = arith.addf %3, %5 : vector<32x128xf32>
    %cst_5 = arith.constant 0.000000e+00 : f32
    %7 = vector.broadcast %cst_5 : f32 to vector<32x128xf32>
    %8 = arith.maximumf %6, %7 : vector<32x128xf32>
    %c0_6 = arith.constant 0 : index
    %c0_7 = arith.constant 0 : index
    %9 = vector.load %arg4[%c0_6, %c0_7] : memref<16x32xbf16, #tpu.memory_space<vmem>>, vector<16x32xbf16>
    %10 = arith.truncf %8 : vector<32x128xf32> to vector<32x128xbf16>
    %cst_8 = arith.constant dense<0.000000e+00> : vector<16x128xf32>
    %11 = tpu.matmul %9, %10, %cst_8 {dimension_numbers = #tpu.dot_dimension_numbers<[1], [0], [0], [1], [0, 0, 1, 1], [], []>} : vector<16x32xbf16>, vector<32x128xbf16>, vector<16x128xf32> -> vector<16x128xf32>
    %c0_9 = arith.constant 0 : index
    %c0_10 = arith.constant 0 : index
    %12 = vector.load %arg5[%c0_9, %c0_10] : memref<16x1xf32, #tpu.memory_space<vmem>>, vector<16x1xf32>
    %13 = vector.broadcast %12 : vector<16x1xf32> to vector<16x128xf32>
    %14 = arith.addf %11, %13 : vector<16x128xf32>
    %cst_11 = arith.constant 0.000000e+00 : f32
    %15 = vector.broadcast %cst_11 : f32 to vector<16x128xf32>
    %16 = arith.maximumf %14, %15 : vector<16x128xf32>
    %c0_12 = arith.constant 0 : index
    %c0_13 = arith.constant 0 : index
    %17 = vector.load %arg6[%c0_12, %c0_13] : memref<1x16xbf16, #tpu.memory_space<vmem>>, vector<1x16xbf16>
    %18 = arith.truncf %16 : vector<16x128xf32> to vector<16x128xbf16>
    %cst_14 = arith.constant dense<0.000000e+00> : vector<1x128xf32>
    %19 = tpu.matmul %17, %18, %cst_14 {dimension_numbers = #tpu.dot_dimension_numbers<[1], [0], [0], [1], [0, 0, 1, 1], [], []>} : vector<1x16xbf16>, vector<16x128xbf16>, vector<1x128xf32> -> vector<1x128xf32>
    %c0_15 = arith.constant 0 : index
    %c0_16 = arith.constant 0 : index
    %20 = vector.load %arg7[%c0_15, %c0_16] : memref<1x1xf32, #tpu.memory_space<vmem>>, vector<1x1xf32>
    %21 = vector.broadcast %20 : vector<1x1xf32> to vector<1x128xf32>
    %22 = arith.addf %19, %21 : vector<1x128xf32>
    %c0_17 = arith.constant 0 : index
    %c0_18 = arith.constant 0 : index
    %23 = vector.load %arg8[%c0_17, %c0_18] : memref<1x128xf32, #tpu.memory_space<vmem>>, vector<1x128xf32>
    tpu.vector_store %arg8[%c0_17, %c0_18], %22 {strides = array<i32>} : memref<1x128xf32, #tpu.memory_space<vmem>>, vector<1x128xf32>,
    return
  }
  func.func @transform_0(%arg0: i32) -> (i32, i32) {
    %c0_i32 = arith.constant 0 : i32
    %c0_i32_0 = arith.constant 0 : i32
    return %c0_i32, %arg0 : i32, i32
  }
  func.func @transform_1(%arg0: i32) -> (i32, i32) {
    %c0_i32 = arith.constant 0 : i32
    %c0_i32_0 = arith.constant 0 : i32
    %c0_i32_1 = arith.constant 0 : i32
    return %c0_i32, %c0_i32_0 : i32, i32
  }
  func.func @transform_2(%arg0: i32) -> (i32, i32) {
    %c0_i32 = arith.constant 0 : i32
    %c0_i32_0 = arith.constant 0 : i32
    %c0_i32_1 = arith.constant 0 : i32
    return %c0_i32, %c0_i32_0 : i32, i32
  }
  func.func @transform_3(%arg0: i32) -> (i32, i32) {
    %c0_i32 = arith.constant 0 : i32
    %c0_i32_0 = arith.constant 0 : i32
    %c0_i32_1 = arith.constant 0 : i32
    return %c0_i32, %c0_i32_0 : i32, i32
  }
  func.func @transform_4(%arg0: i32) -> (i32, i32) {
    %c0_i32 = arith.constant 0 : i32
    %c0_i32_0 = arith.constant 0 : i32
    %c0_i32_1 = arith.constant 0 : i32
    return %c0_i32, %c0_i32_0 : i32, i32
  }
  func.func @transform_5(%arg0: i32) -> (i32, i32) {
    %c0_i32 = arith.constant 0 : i32
    %c0_i32_0 = arith.constant 0 : i32
    %c0_i32_1 = arith.constant 0 : i32
    return %c0_i32, %c0_i32_0 : i32, i32
  }
  func.func @transform_6(%arg0: i32) -> (i32, i32) {
    %c0_i32 = arith.constant 0 : i32
    %c0_i32_0 = arith.constant 0 : i32
    %c0_i32_1 = arith.constant 0 : i32
    return %c0_i32, %c0_i32_0 : i32, i32
  }
  func.func @transform_7(%arg0: i32) -> (i32, i32) {
    %c0_i32 = arith.constant 0 : i32
    %c0_i32_0 = arith.constant 0 : i32
    return %c0_i32, %arg0 : i32, i32
  }
}

</mosaic_0001>

<bundles_post_ra>
// kernel: tpu_custom_call.1
= control target key start
LH: loop header
LB: loop body
LE: loop exit
PB: predicated region body
PF: predicated region fallthrough
CT: control target
= control target key end

     0   :  { %s427_s0 = inlined_call_operand.vmem [shape: f32[10,128], index: 0, kind: input, shape index: {}]   ;;  %s428_s1 = inlined_call_operand.vmem [shape: bf16[32,10], index: 1, kind: input, shape index: {}]   ;;  %s429_s2 = inlined_call_operand.vmem [shape: f32[32,1], index: 2, kind: input, shape index: {}]   ;;  %s430_s3 = inlined_call_operand.vmem [shape: bf16[16,32], index: 3, kind: input, shape index: {}]   ;;  %s431_s4 = inlined_call_operand.vmem [shape: f32[16,1], index: 4, kind: input, shape index: {}]   ;;  %s432_s5 = inlined_call_operand.vmem [shape: bf16[1,16], index: 5, kind: input, shape index: {}]   ;;  %s433_s6 = inlined_call_operand.<no memory space> [shape: f32[1,1], index: 6, kind: input, shape index: {}]   ;;  %s434_s7 = inlined_call_operand.hbm [shape: f32[1,128], index: 7, kind: output, shape index: {}]  }
   0x1   :  { %v12_v0 = vstv %s433_s6 }
   0x2   :  { %13 = vst [vmem:[#allocation2] sm:$0x1] %v12_v0 }
   0x3   :  { %v30_v1 = vld [vmem:[%s427_s0] sm:$0xff]  ;;  %v31_v2 = vld [vmem:[%s427_s0 + $0x8] sm:$0x3]  ;;  %vm78_vm0 = vcmask 1044480   ;;  %vm71_vm1 = vcmask 80896   ;;  %v39_v5 = vld [vmem:[%s429_s2 + $0x10] sm:$0xff] }
   0x4   :  { %v32_v3 = vpack.c.bf16 %v31_v2, %v30_v1  ;;  %v316_v4 = vld [vmem:[%s428_s1] sm:$0xff]   ;;  %v317_v7 = vld [vmem:[%s428_s1 + $0x8] sm:$0xff]   ;;  %v341_v9 = vmov 0  }
   0x5   :  { %291 = vmatprep.mubr.msk.bf16.mxu0 %vm71_vm1, %v316_v4  ;;  %v37_v8 = vld [vmem:[%s429_s2] sm:$0xff]  ;;  %314 = vset.pattern.permute.xlu0 %v341_v9 }
   0x6   :  { %309 = vmatprep.subr.msk.bf16.mxu0 %vm78_vm0, %v32_v3  ;;  %v80_v6 = vsel %vm78_vm0, %v32_v3, 0  ;;  %53 = vperm.xlu0 %314, %v39_v5  }
   0x7   :  { %290 = vmatpush3.bf16.msra.mxu0 %v80_v6  ;;  %315 = vset.pattern.permute.xlu1 %v341_v9 }
   0x8   :  { %14 = vsyncpa [#allocation4], 0  ;;  %v40_v10 = vld [vmem:[%s429_s2 + $0x18] sm:$0xff]  ;;  %43 = vperm.xlu1 %315, %v37_v8   ;;  %v38_v11 = vld [vmem:[%s429_s2 + $0x8] sm:$0xff]  ;;  %v342_v15 = vmov 0.0   ;;  %vm343_vm2 = vmmov 0   ;;  %v211_v47 = vlaneseq }
   0x9   :  { %v139_v12 = vld [vmem:[%s431_s4] sm:$0xff]  ;;  %v140_v13 = vld [vmem:[%s431_s4 + $0x8] sm:$0xff]  ;;  %295 = vmatprep.subr.bf16.mxu1 %v342_v15  ;;  %303 = vmatprep.subr.bf16.mxu0 %v342_v15  ;;  %vm156_vm3 = vcmask 261120   ;;  %vm215_vm4 = vcmask 130048  }
   0xa   :  { %292 = vmatmul.mubr.msk.bf16.vlgmr.msra.gmra.mxu0 %vm71_vm1, %v317_v7  ;;  %58 = vperm.xlu0 %314, %v40_v10   ;;  %v205_v14 = vld [vmem:[#allocation2] sm:$0x1]  ;;  %v212_v48 = vshrl.u32 %v211_v47, 7 }
   0xb   :  { %299 = vmatprep.mubr.msk.bf16.mxu1 %vm343_vm2, %v342_v15  ;;  %305 = vmatprep.mubr.msk.bf16.mxu0 %vm343_vm2, %v342_v15  ;;  %v318_v34 = vld [vmem:[%s430_s3] sm:$0xff]   ;;  %s344_s3 = smov [#allocation3]  }
   0xc   :  { %48 = vperm.xlu1 %315, %v38_v11   ;;  %v203_v46 = vld [vmem:[%s432_s5] sm:$0x1]  ;;  %v213_v49 = vsub.s32 0, %v212_v48  ;;  %s266_s22 = sshll.u32 %s344_s3, 4  ;;  %s267_s22 = int_to_ptr.vmem [resolvable:$true] %s266_s22 }
   0xd   :  { %s319_s23 = scalar_lea.vmem %s267_s22, 16  ;;  %s323_s24 = scalar_lea.vmem %s267_s22, 32 }
   0xe   :  { %143 = vperm.xlu0 %314, %v139_v12   ;;  %p320_p0 = scmp.ne.s32.totalorder %s267_s22, %s319_s23  ;;  %p324_p1 = scmp.lt.s32.totalorder %s267_s22, %s267_s22 }
   0xf   :  { %p325_p2 = scmp.lt.s32.totalorder %s323_s24, %s319_s23 }
  0x10   :  { %148 = vperm.xlu1 %315, %v140_v13  }
  0x11   :  { %p326_p3 = por %p325_p2, %p324_p1 }
  0x12   :  { %208 = vperm.xlu0 %314, %v205_v14  }
  0x13   :  { %p327_p4 = pnand %p326_p3, %p320_p0 }
  0x81   :  { %v54_v16 = vpop.permute.xlu0 %53 }
  0x83   :  { %v44_v17 = vpop.permute.xlu1 %43 }
  0x85   :  { %v59_v21 = vpop.permute.xlu0 %58 }
  0x87   :  { %v49_v24 = vpop.permute.xlu1 %48 }
  0x89   :  { %v144_v36 = vpop.permute.xlu0 %143 }
  0x8b   :  { %v149_v39 = vpop.permute.xlu1 %148 }
  0x8d   :  { %v209_v50 = vpop.permute.xlu0 %208 }
  0x8e   :  { %v214_v51 = vrot.slane %v209_v50, %v213_v49 }
  0xca   :  { %v293_v18 = vpop.f32.mrf.mxu0 }
  0xcb   :  { %v125_v20 = vadd.f32 %v293_v18, %v54_v16 }
  0xcc   :  { %v116_v19 = vpop.f32.mrf.mxu0 }
  0xcd   :  { %v133_v26 = vmax.f32 %v125_v20, 0.0  ;;  %v117_v27 = vadd.f32 %v116_v19, %v44_v17 }
  0xce   :  { %v294_v22 = vpop.f32.mrf.mxu0 }
  0xcf   :  { %v128_v23 = vadd.f32 %v294_v22, %v59_v21  ;;  %v131_v32 = vmax.f32 %v117_v27, 0.0 }
  0xd0   :  { %v119_v25 = vpop.f32.mrf.mxu0 }
  0xd1   :  { %v134_v28 = vmax.f32 %v128_v23, 0.0  ;;  %v120_v29 = vadd.f32 %v119_v25, %v49_v24 }
  0xd3   :  { %v132_v30 = vmax.f32 %v120_v29, 0.0  ;;  %v138_v31 = vpack.c.bf16 %v134_v28, %v133_v26 }
  0xd5   :  { %296 = vmatpush3.bf16.msra.mxu1 %v138_v31  ;;  %v137_v33 = vpack.c.bf16 %v132_v30, %v131_v32 }
  0xd6   :  { %297 = vmatprep.subr.bf16.mxu1 %v342_v15 }
  0xd9   :  { %298 = vmatpush3.bf16.msra.mxu1 %v137_v33 }
  0xdc   :  { %300 = vmatmul.mubr.msk.bf16.vlgmr.msra.gmra.mxu1 %vm156_vm3, %v318_v34 }
 0x19c   :  { %v194_v35 = vpop.f32.mrf.mxu1 }
 0x19d   :  { %v195_v38 = vadd.f32 %v194_v35, %v144_v36 }
 0x19e   :  { %v301_v37 = vpop.f32.mrf.mxu1 }
 0x19f   :  { %v201_v43 = vmax.f32 %v195_v38, 0.0 }
 0x1a0   :  { %v197_v40 = vpop.f32.mrf.mxu1 }
 0x1a1   :  { %v198_v41 = vadd.f32 %v197_v40, %v149_v39 }
 0x1a2   :  { %v302_v42 = vpop.f32.mrf.mxu1 }
 0x1a3   :  { %v202_v44 = vmax.f32 %v198_v41, 0.0 }
 0x1a5   :  { %v204_v45 = vpack.c.bf16 %v202_v44, %v201_v43 }
 0x1a7   :  { %304 = vmatpush3.bf16.msra.mxu0 %v204_v45 }
 0x1aa   :  { %306 = vmatmul.mubr.msk.bf16.vlgmr.msra.gmra.mxu0 %vm215_vm4, %v203_v46 }
 0x26a   :  { %v253_v52 = vpop.f32.mrf.mxu0 }
 0x26b   :  { %v254_v53 = vadd.f32 %v253_v52, %v214_v51 }
 0x26c   :  { %v307_v54 = vpop.f32.mrf.mxu0 }
 0x26d   :  { %259 = vst [vmem:[#allocation3] sm:$0x1] %v254_v53 }
 0x26e   :  { %v256_v55 = vpop.f32.mrf.mxu0 }
 0x26f   :  { %330 = shalt.err (!%p327_p4)
}
 0x270   :  { %269 = dma.vmem_to_hbm [thread:$0]  %s267_s22, 16, %s434_s7, [#allocation4]   ;;  %v308_v56 = vpop.f32.mrf.mxu0 }
 0x271   :  { %339 = dma.done.wait [#allocation4], 16  }
 0x272   :  { %340 = vsyncadd [#allocation4], 4294967280 }
 0x273   :  { %273 = vsyncpa [#allocation4], 1 }

</bundles_post_ra>
